<compile_context>
chip_gen: v5e
topology: v5e:2x2
jax: 0.10.0
libtpu: 0.0.40
codegen_flags: <defaults>
</compile_context>

<pallas_src>
import functools

import jax
import jax.numpy as jnp
from jax.experimental import pallas as pl
from jax.experimental.pallas import tpu as pltpu

LANE = 128
TILE_ROWS = 2048                 # rows of the (rows, 128) view per grid step (1 MiB f32 block)
NUM_CORES = 2                    # "parallel" axis: 2 TensorCores on v7x, harmless serial loop elsewhere
VMEM_LIMIT_BYTES = 32 * 1024 * 1024


def _sigmoid(x):
    """Numerically stable sigmoid using EUP exp + approx reciprocal (off the VALU slot)."""
    e = jnp.exp(-jnp.abs(x))                      # e in (0, 1]
    r = pl.reciprocal(1.0 + e, approx=True)       # 1/(1+e), EUP
    return jnp.where(x >= 0.0, r, e * r)


# ---------------------------------------------------------------------------
# Unified streaming-reduction kernel
# ---------------------------------------------------------------------------
def _dice_kernel(p_ref, g_ref, *rest, logit, tile_rows, valid_rows, has_mask):
    if has_mask:
        m_ref, out_ref, acc_ref = rest
    else:
        m_ref = None
        out_ref, acc_ref = rest

    c = pl.program_id(0)          # "parallel" core index
    i = pl.program_id(1)          # sequential step on this core
    steps = pl.num_programs(1)

    @pl.when(i == 0)
    def _init():
        acc_ref[...] = jnp.zeros_like(acc_ref)

    p = p_ref[...].astype(jnp.float32)
    if logit:
        p = _sigmoid(p)
    g = g_ref[...].astype(jnp.float32)

    if has_mask:
        # One flag per 128-wide row (slice mask expanded to rows on the host).
        # PyTorch casts the mask to float16 before the == 1.0 compare; for {0,1}
        # masks the float32 compare here is identical.
        keep = m_ref[...] == 1.0                  # (tile_rows, 1) -> lane broadcast
        p = jnp.where(keep, p, 0.0)
        g = jnp.where(keep, g, 0.0)

    k = tile_rows // 8

    def _accum(pv, gv):
        # Per-step reduction stays elementwise on the VPU: fold sublane-blocks into a
        # (8, 128) vreg-shaped accumulator per quantity (no per-step cross-lane reduce).
        acc_ref[0] += jnp.sum((pv * gv).reshape(k, 8, LANE), axis=0)
        acc_ref[1] += jnp.sum(pv.reshape(k, 8, LANE), axis=0)
        acc_ref[2] += jnp.sum(gv.reshape(k, 8, LANE), axis=0)

    block = c * steps + i
    interior = (block + 1) * tile_rows <= valid_rows   # fully-valid block?

    @pl.when(interior)
    def _fast():                                   # interior blocks: no validity masking
        _accum(p, g)

    @pl.when(jnp.logical_not(interior))
    def _edge():                                   # edge / clamped-duplicate blocks only
        row_ids = block * tile_rows + jax.lax.broadcasted_iota(
            jnp.int32, (tile_rows, LANE), 0)
        valid = row_ids < valid_rows
        _accum(jnp.where(valid, p, 0.0), jnp.where(valid, g, 0.0))

    @pl.when(i == steps - 1)
    def _finish():
        out_ref[0] = acc_ref[...]


def _prep_rows(arr2d):
    """Pad tiny inputs up to 8 rows (fill is neutralized by the in-kernel row mask)."""
    rows = arr2d.shape[0]
    if rows < 8:
        arr2d = jnp.pad(arr2d, ((0, 8 - rows), (0, 0)), constant_values=0)
    return arr2d


def _dice_sums_2d(p2, g2, row_mask, *, logit, valid_rows):
    """p2/g2: (rows, 128) native dtype; row_mask: (rows, 1) f32 or None."""
    rows = p2.shape[0]
    tile_rows = min(TILE_ROWS, (rows // 8) * 8)
    num_blocks = -(-rows // tile_rows)
    ncores = min(NUM_CORES, num_blocks)
    steps = -(-num_blocks // ncores)

    def data_map(c, i):
        # clamp so a core never starts a block past the array; the duplicated block is
        # fully zeroed by the in-kernel edge masking.
        return (jnp.minimum(c * steps + i, num_blocks - 1), 0)

    data_spec = pl.BlockSpec((tile_rows, LANE), data_map)
    in_specs = [data_spec, data_spec]
    operands = [p2, g2]
    if row_mask is not None:
        in_specs.append(pl.BlockSpec((tile_rows, 1), data_map))
        operands.append(row_mask)
    out_spec = pl.BlockSpec((1, 3, 8, LANE), lambda c, i: (c, 0, 0, 0))

    kernel = functools.partial(
        _dice_kernel, logit=logit, tile_rows=tile_rows,
        valid_rows=valid_rows, has_mask=row_mask is not None)

    partials = pl.pallas_call(
        kernel,
        out_shape=jax.ShapeDtypeStruct((ncores, 3, 8, LANE), jnp.float32),
        grid_spec=pltpu.PrefetchScalarGridSpec(
            num_scalar_prefetch=0,
            grid=(ncores, steps),
            in_specs=in_specs,
            out_specs=out_spec,
            scratch_shapes=[pltpu.VMEM((3, 8, LANE), jnp.float32)],
        ),
        compiler_params=pltpu.CompilerParams(
            dimension_semantics=("parallel", "arbitrary"),
            vmem_limit_bytes=VMEM_LIMIT_BYTES),
    )(*operands)

    sums = jnp.sum(partials, axis=(0, 2, 3))   # (3,) final cross-lane reduce in XLA
    return sums[0], sums[1], sums[2]


# ---------------------------------------------------------------------------
# mask=None path
# ---------------------------------------------------------------------------
def _dice_sums_nomask(pred, gt, *, logit):
    pf = pred.reshape(-1)
    gf = gt.reshape(-1)
    n = pf.shape[0]
    main = (n // LANE) * LANE
    tail = n - main

    s_pg = jnp.float32(0.0)
    s_p = jnp.float32(0.0)
    s_g = jnp.float32(0.0)

    if tail:  # ragged lane tail (< 128 elems): tiny plain-XLA reduce, no full-array pad copy
        pt = pf[main:].astype(jnp.float32)
        if logit:
            pt = jax.nn.sigmoid(pt)
        gt_t = gf[main:].astype(jnp.float32)
        s_pg = jnp.sum(pt * gt_t)
        s_p = jnp.sum(pt)
        s_g = jnp.sum(gt_t)

    if main:
        rows = main // LANE
        p2 = _prep_rows(pf[:main].reshape(rows, LANE))
        g2 = _prep_rows(gf[:main].reshape(rows, LANE))
        k_pg, k_p, k_g = _dice_sums_2d(p2, g2, None, logit=logit, valid_rows=rows)
        s_pg = s_pg + k_pg
        s_p = s_p + k_p
        s_g = s_g + k_g
    return s_pg, s_p, s_g


# ---------------------------------------------------------------------------
# per-slice (B, C) mask path
# ---------------------------------------------------------------------------
def _dice_sums_masked(pred, gt, mask, *, logit):
    n_slices = pred.shape[0] * pred.shape[1]
    hw = 1
    for d in pred.shape[2:]:
        hw *= d
    mask_flat = mask.reshape(-1).astype(jnp.float32)

    if hw % LANE != 0:
        # TODO(synk): non-lane-aligned slice size (H*W % 128 != 0) falls back to plain XLA.
        keep = jnp.repeat(mask_flat == 1.0, hw)
        p = pred.reshape(-1).astype(jnp.float32)
        if logit:
            p = jax.nn.sigmoid(p)
        g = gt.reshape(-1).astype(jnp.float32)
        pm = jnp.where(keep, p, 0.0)
        gm = jnp.where(keep, g, 0.0)
        return jnp.sum(pm * gm), jnp.sum(pm), jnp.sum(gm)

    rows_per_slice = hw // LANE
    rows = n_slices * rows_per_slice
    # Only a tiny (rows, 1) per-row flag is materialized/streamed (n/128 floats), never
    # the full-size broadcast mask the PyTorch code builds.
    row_mask = jnp.repeat(mask_flat, rows_per_slice).reshape(rows, 1)

    p2 = _prep_rows(pred.reshape(rows, LANE))
    g2 = _prep_rows(gt.reshape(rows, LANE))
    row_mask = _prep_rows(row_mask)
    return _dice_sums_2d(p2, g2, row_mask, logit=logit, valid_rows=rows)


# ---------------------------------------------------------------------------
# Public wrapper (MaskedDiceLoss.forward)
# ---------------------------------------------------------------------------
def masked_dice_loss(pred, gt, mask=None, *, logit=True, smooth=0.1):
    """JAX/Pallas equivalent of MaskedDiceLoss(logit, smooth).forward(pred, gt, mask)."""
    if mask is None:
        s_pg, s_p, s_g = _dice_sums_nomask(pred, gt, logit=logit)
    else:
        s_pg, s_p, s_g = _dice_sums_masked(pred, gt, mask, logit=logit)
    dice = (2.0 * s_pg + smooth) / (s_p + s_g + smooth)
    return 1.0 - dice


# ---------------------------------------------------------------------------
# Reference + demo
# ---------------------------------------------------------------------------
def _reference(pred, gt, mask, *, logit, smooth):
    p = pred.astype(jnp.float32)
    if logit:
        p = jax.nn.sigmoid(p)
    g = gt.astype(jnp.float32)
    if mask is None:
        keep = jnp.ones_like(p, dtype=bool)
    else:
        keep = jnp.broadcast_to(
            mask.astype(jnp.float32)[..., None, None], p.shape) == 1.0
    pm = jnp.where(keep, p, 0.0)
    gm = jnp.where(keep, g, 0.0)
    dice = (2.0 * jnp.sum(pm * gm) + smooth) / (jnp.sum(pm) + jnp.sum(gm) + smooth)
    return 1.0 - dice


if __name__ == "__main__":
    key = jax.random.PRNGKey(0)
    k1, k2, k3 = jax.random.split(key, 3)

    B, C, H, W = 2, 4, 16, 16
    pred = jax.random.normal(k1, (B, C, H, W), dtype=jnp.float32)           # logits
    gt = (jax.random.uniform(k2, (B, C, H, W)) > 0.5).astype(jnp.float32)   # binary gt

    # pl.reciprocal(approx=True) inside the in-kernel sigmoid is a few ulps off the exact
    # jax.nn.sigmoid reference, hence the 1e-3 tolerances.
    TOL = dict(rtol=1e-3, atol=1e-3)

    # mask=None fast path
    loss = masked_dice_loss(pred, gt, mask=None, logit=True, smooth=0.1)
    loss = jax.block_until_ready(loss)
    ref = _reference(pred, gt, None, logit=True, smooth=0.1)
    assert jnp.allclose(loss, ref, **TOL), (loss, ref)

    # native bf16 gt streaming (kernel upcasts in-register; 0/1 values are exact in bf16)
    loss_bf = masked_dice_loss(pred, gt.astype(jnp.bfloat16), mask=None, logit=True, smooth=0.1)
    loss_bf = jax.block_until_ready(loss_bf)
    assert jnp.allclose(loss_bf, ref, **TOL), (loss_bf, ref)

    # per-slice mask path
    mask = (jax.random.uniform(k3, (B, C)) > 0.4).astype(jnp.float32)
    loss_m = masked_dice_loss(pred, gt, mask=mask, logit=True, smooth=0.1)
    loss_m = jax.block_until_ready(loss_m)
    ref_m = _reference(pred, gt, mask, logit=True, smooth=0.1)
    assert jnp.allclose(loss_m, ref_m, **TOL), (loss_m, ref_m)

    print("KERNEL_OK")
</pallas_src>

<mosaic_0001>
module attributes {stable_mosaic.version = 11 : i64} {
  func.func @_dice_kernel(%arg0: i32, %arg1: i32, %arg2: memref<16x128xf32, #tpu.memory_space<vmem>>, %arg3: memref<16x128xf32, #tpu.memory_space<vmem>>, %arg4: memref<1x3x8x128xf32, #tpu.memory_space<vmem>>, %arg5: memref<3x8x128xf32, #tpu.memory_space<vmem>>) attributes {dimension_semantics = [#tpu.dimension_semantics<parallel>, #tpu.dimension_semantics<arbitrary>], iteration_bounds = array<i64: 1, 1>, scalar_prefetch = 0 : i64, scratch_operands = 1 : i64, tpu.core_type = #tpu.core_type<tc>, window_params = [{transform_indices = @transform_0, window_bounds = array<i64: 16, 128>}, {transform_indices = @transform_1, window_bounds = array<i64: 16, 128>}, {transform_indices = @transform_2, window_bounds = array<i64: 1, 3, 8, 128>}]} {
    %c0_i32 = arith.constant 0 : i32
    %0 = arith.cmpi eq, %arg1, %c0_i32 : i32
    %1 = arith.extui %0 : i1 to i32
    %c0_i32_0 = arith.constant 0 : i32
    %2 = arith.cmpi ne, %1, %c0_i32_0 : i32
    scf.if %2 {
      %cst_12 = arith.constant 0.000000e+00 : f32
      %29 = vector.broadcast %cst_12 : f32 to vector<3x8x128xf32>
      %c0_13 = arith.constant 0 : index
      %c0_14 = arith.constant 0 : index
      %c0_15 = arith.constant 0 : index
      %30 = vector.load %arg5[%c0_13, %c0_14, %c0_15] : memref<3x8x128xf32, #tpu.memory_space<vmem>>, vector<3x8x128xf32>
      tpu.vector_store %arg5[%c0_13, %c0_14, %c0_15], %29 {strides = array<i32>} : memref<3x8x128xf32, #tpu.memory_space<vmem>>, vector<3x8x128xf32>,
    } else {
    }
    %c0 = arith.constant 0 : index
    %c0_1 = arith.constant 0 : index
    %3 = vector.load %arg2[%c0, %c0_1] : memref<16x128xf32, #tpu.memory_space<vmem>>, vector<16x128xf32>
    %4 = math.absf %3 : vector<16x128xf32>
    %cst = arith.constant 0.000000e+00 : f32
    %5 = vector.broadcast %cst : f32 to vector<16x128xf32>
    %6 = arith.subf %5, %4 : vector<16x128xf32>
    %7 = math.exp %6 : vector<16x128xf32>
    %cst_2 = arith.constant 1.000000e+00 : f32
    %8 = vector.broadcast %cst_2 : f32 to vector<16x128xf32>
    %9 = arith.addf %8, %7 : vector<16x128xf32>
    %10 = tpu.reciprocal %9 {approx = true} : vector<16x128xf32> -> vector<16x128xf32>
    %cst_3 = arith.constant 0.000000e+00 : f32
    %11 = vector.broadcast %cst_3 : f32 to vector<16x128xf32>
    %12 = arith.cmpf oge, %3, %11 : vector<16x128xf32>
    %13 = arith.mulf %7, %10 : vector<16x128xf32>
    %14 = arith.select %12, %10, %13 : vector<16x128xi1>, vector<16x128xf32>
    %c0_4 = arith.constant 0 : index
    %c0_5 = arith.constant 0 : index
    %15 = vector.load %arg3[%c0_4, %c0_5] : memref<16x128xf32, #tpu.memory_space<vmem>>, vector<16x128xf32>
    %c1_i32 = arith.constant 1 : i32
    %16 = arith.muli %arg0, %c1_i32 : i32
    %17 = arith.addi %16, %arg1 : i32
    %c1_i32_6 = arith.constant 1 : i32
    %18 = arith.addi %17, %c1_i32_6 : i32
    %c16_i32 = arith.constant 16 : i32
    %19 = arith.muli %18, %c16_i32 : i32
    %c16_i32_7 = arith.constant 16 : i32
    %20 = arith.cmpi sle, %19, %c16_i32_7 : i32
    %21 = arith.extui %20 : i1 to i32
    %c0_i32_8 = arith.constant 0 : i32
    %22 = arith.cmpi ne, %21, %c0_i32_8 : i32
    scf.if %22 {
      %c0_12 = arith.constant 0 : index
      %c0_13 = arith.constant 0 : index
      %c0_14 = arith.constant 0 : index
      %29 = vector.load %arg5[%c0_12, %c0_13, %c0_14] : memref<3x8x128xf32, #tpu.memory_space<vmem>>, vector<1x8x128xf32>
      %30 = vector.shape_cast %29 : vector<1x8x128xf32> to vector<8x128xf32>
      %31 = arith.mulf %14, %15 : vector<16x128xf32>
      %32 = vector.shape_cast %31 : vector<16x128xf32> to vector<2x8x128xf32>
      %cst_15 = arith.constant dense<0.000000e+00> : vector<8x128xf32>
      %33 = vector.multi_reduction <add>, %32, %cst_15 [0] : vector<2x8x128xf32> to vector<8x128xf32>
      %34 = arith.addf %30, %33 : vector<8x128xf32>
      %c0_16 = arith.constant 0 : index
      %c0_17 = arith.constant 0 : index
      %c0_18 = arith.constant 0 : index
      %35 = vector.load %arg5[%c0_16, %c0_17, %c0_18] : memref<3x8x128xf32, #tpu.memory_space<vmem>>, vector<1x8x128xf32>
      %36 = vector.shape_cast %35 : vector<1x8x128xf32> to vector<8x128xf32>
      %37 = vector.shape_cast %34 : vector<8x128xf32> to vector<1x8x128xf32>
      tpu.vector_store %arg5[%c0_16, %c0_17, %c0_18], %37 {strides = array<i32>} : memref<3x8x128xf32, #tpu.memory_space<vmem>>, vector<1x8x128xf32>,
      %c1 = arith.constant 1 : index
      %c0_19 = arith.constant 0 : index
      %c0_20 = arith.constant 0 : index
      %38 = vector.load %arg5[%c1, %c0_19, %c0_20] : memref<3x8x128xf32, #tpu.memory_space<vmem>>, vector<1x8x128xf32>
      %39 = vector.shape_cast %38 : vector<1x8x128xf32> to vector<8x128xf32>
      %40 = vector.shape_cast %14 : vector<16x128xf32> to vector<2x8x128xf32>
      %cst_21 = arith.constant dense<0.000000e+00> : vector<8x128xf32>
      %41 = vector.multi_reduction <add>, %40, %cst_21 [0] : vector<2x8x128xf32> to vector<8x128xf32>
      %42 = arith.addf %39, %41 : vector<8x128xf32>
      %c1_22 = arith.constant 1 : index
      %c0_23 = arith.constant 0 : index
      %c0_24 = arith.constant 0 : index
      %43 = vector.load %arg5[%c1_22, %c0_23, %c0_24] : memref<3x8x128xf32, #tpu.memory_space<vmem>>, vector<1x8x128xf32>
      %44 = vector.shape_cast %43 : vector<1x8x128xf32> to vector<8x128xf32>
      %45 = vector.shape_cast %42 : vector<8x128xf32> to vector<1x8x128xf32>
      tpu.vector_store %arg5[%c1_22, %c0_23, %c0_24], %45 {strides = array<i32>} : memref<3x8x128xf32, #tpu.memory_space<vmem>>, vector<1x8x128xf32>,
      %c2 = arith.constant 2 : index
      %c0_25 = arith.constant 0 : index
      %c0_26 = arith.constant 0 : index
      %46 = vector.load %arg5[%c2, %c0_25, %c0_26] : memref<3x8x128xf32, #tpu.memory_space<vmem>>, vector<1x8x128xf32>
      %47 = vector.shape_cast %46 : vector<1x8x128xf32> to vector<8x128xf32>
      %48 = vector.shape_cast %15 : vector<16x128xf32> to vector<2x8x128xf32>
      %cst_27 = arith.constant dense<0.000000e+00> : vector<8x128xf32>
      %49 = vector.multi_reduction <add>, %48, %cst_27 [0] : vector<2x8x128xf32> to vector<8x128xf32>
      %50 = arith.addf %47, %49 : vector<8x128xf32>
      %c2_28 = arith.constant 2 : index
      %c0_29 = arith.constant 0 : index
      %c0_30 = arith.constant 0 : index
      %51 = vector.load %arg5[%c2_28, %c0_29, %c0_30] : memref<3x8x128xf32, #tpu.memory_space<vmem>>, vector<1x8x128xf32>
      %52 = vector.shape_cast %51 : vector<1x8x128xf32> to vector<8x128xf32>
      %53 = vector.shape_cast %50 : vector<8x128xf32> to vector<1x8x128xf32>
      tpu.vector_store %arg5[%c2_28, %c0_29, %c0_30], %53 {strides = array<i32>} : memref<3x8x128xf32, #tpu.memory_space<vmem>>, vector<1x8x128xf32>,
    } else {
    }
    %true = arith.constant true
    %23 = arith.xori %20, %true : i1
    %24 = arith.extui %23 : i1 to i32
    %c0_i32_9 = arith.constant 0 : i32
    %25 = arith.cmpi ne, %24, %c0_i32_9 : i32
    scf.if %25 {
      %c16_i32_12 = arith.constant 16 : i32
      %29 = arith.muli %17, %c16_i32_12 : i32
      %30 = tpu.iota {dimensions = array<i32: 0>} : vector<16x128xi32>
      %31 = vector.broadcast %29 : i32 to vector<16x128xi32>
      %32 = arith.addi %31, %30 : vector<16x128xi32>
      %c16_i32_13 = arith.constant 16 : i32
      %33 = vector.broadcast %c16_i32_13 : i32 to vector<16x128xi32>
      %34 = arith.cmpi slt, %32, %33 : vector<16x128xi32>
      %cst_14 = arith.constant 0.000000e+00 : f32
      %35 = vector.broadcast %cst_14 : f32 to vector<16x128xf32>
      %36 = arith.select %34, %14, %35 : vector<16x128xi1>, vector<16x128xf32>
      %cst_15 = arith.constant 0.000000e+00 : f32
      %37 = vector.broadcast %cst_15 : f32 to vector<16x128xf32>
      %38 = arith.select %34, %15, %37 : vector<16x128xi1>, vector<16x128xf32>
      %c0_16 = arith.constant 0 : index
      %c0_17 = arith.constant 0 : index
      %c0_18 = arith.constant 0 : index
      %39 = vector.load %arg5[%c0_16, %c0_17, %c0_18] : memref<3x8x128xf32, #tpu.memory_space<vmem>>, vector<1x8x128xf32>
      %40 = vector.shape_cast %39 : vector<1x8x128xf32> to vector<8x128xf32>
      %41 = arith.mulf %36, %38 : vector<16x128xf32>
      %42 = vector.shape_cast %41 : vector<16x128xf32> to vector<2x8x128xf32>
      %cst_19 = arith.constant dense<0.000000e+00> : vector<8x128xf32>
      %43 = vector.multi_reduction <add>, %42, %cst_19 [0] : vector<2x8x128xf32> to vector<8x128xf32>
      %44 = arith.addf %40, %43 : vector<8x128xf32>
      %c0_20 = arith.constant 0 : index
      %c0_21 = arith.constant 0 : index
      %c0_22 = arith.constant 0 : index
      %45 = vector.load %arg5[%c0_20, %c0_21, %c0_22] : memref<3x8x128xf32, #tpu.memory_space<vmem>>, vector<1x8x128xf32>
      %46 = vector.shape_cast %45 : vector<1x8x128xf32> to vector<8x128xf32>
      %47 = vector.shape_cast %44 : vector<8x128xf32> to vector<1x8x128xf32>
      tpu.vector_store %arg5[%c0_20, %c0_21, %c0_22], %47 {strides = array<i32>} : memref<3x8x128xf32, #tpu.memory_space<vmem>>, vector<1x8x128xf32>,
      %c1 = arith.constant 1 : index
      %c0_23 = arith.constant 0 : index
      %c0_24 = arith.constant 0 : index
      %48 = vector.load %arg5[%c1, %c0_23, %c0_24] : memref<3x8x128xf32, #tpu.memory_space<vmem>>, vector<1x8x128xf32>
      %49 = vector.shape_cast %48 : vector<1x8x128xf32> to vector<8x128xf32>
      %50 = vector.shape_cast %36 : vector<16x128xf32> to vector<2x8x128xf32>
      %cst_25 = arith.constant dense<0.000000e+00> : vector<8x128xf32>
      %51 = vector.multi_reduction <add>, %50, %cst_25 [0] : vector<2x8x128xf32> to vector<8x128xf32>
      %52 = arith.addf %49, %51 : vector<8x128xf32>
      %c1_26 = arith.constant 1 : index
      %c0_27 = arith.constant 0 : index
      %c0_28 = arith.constant 0 : index
      %53 = vector.load %arg5[%c1_26, %c0_27, %c0_28] : memref<3x8x128xf32, #tpu.memory_space<vmem>>, vector<1x8x128xf32>
      %54 = vector.shape_cast %53 : vector<1x8x128xf32> to vector<8x128xf32>
      %55 = vector.shape_cast %52 : vector<8x128xf32> to vector<1x8x128xf32>
      tpu.vector_store %arg5[%c1_26, %c0_27, %c0_28], %55 {strides = array<i32>} : memref<3x8x128xf32, #tpu.memory_space<vmem>>, vector<1x8x128xf32>,
      %c2 = arith.constant 2 : index
      %c0_29 = arith.constant 0 : index
      %c0_30 = arith.constant 0 : index
      %56 = vector.load %arg5[%c2, %c0_29, %c0_30] : memref<3x8x128xf32, #tpu.memory_space<vmem>>, vector<1x8x128xf32>
      %57 = vector.shape_cast %56 : vector<1x8x128xf32> to vector<8x128xf32>
      %58 = vector.shape_cast %38 : vector<16x128xf32> to vector<2x8x128xf32>
      %cst_31 = arith.constant dense<0.000000e+00> : vector<8x128xf32>
      %59 = vector.multi_reduction <add>, %58, %cst_31 [0] : vector<2x8x128xf32> to vector<8x128xf32>
      %60 = arith.addf %57, %59 : vector<8x128xf32>
      %c2_32 = arith.constant 2 : index
      %c0_33 = arith.constant 0 : index
      %c0_34 = arith.constant 0 : index
      %61 = vector.load %arg5[%c2_32, %c0_33, %c0_34] : memref<3x8x128xf32, #tpu.memory_space<vmem>>, vector<1x8x128xf32>
      %62 = vector.shape_cast %61 : vector<1x8x128xf32> to vector<8x128xf32>
      %63 = vector.shape_cast %60 : vector<8x128xf32> to vector<1x8x128xf32>
      tpu.vector_store %arg5[%c2_32, %c0_33, %c0_34], %63 {strides = array<i32>} : memref<3x8x128xf32, #tpu.memory_space<vmem>>, vector<1x8x128xf32>,
    } else {
    }
    %c0_i32_10 = arith.constant 0 : i32
    %26 = arith.cmpi eq, %arg1, %c0_i32_10 : i32
    %27 = arith.extui %26 : i1 to i32
    %c0_i32_11 = arith.constant 0 : i32
    %28 = arith.cmpi ne, %27, %c0_i32_11 : i32
    scf.if %28 {
      %c0_12 = arith.constant 0 : index
      %c0_13 = arith.constant 0 : index
      %c0_14 = arith.constant 0 : index
      %29 = vector.load %arg5[%c0_12, %c0_13, %c0_14] : memref<3x8x128xf32, #tpu.memory_space<vmem>>, vector<3x8x128xf32>
      %c0_15 = arith.constant 0 : index
      %c0_16 = arith.constant 0 : index
      %c0_17 = arith.constant 0 : index
      %c0_18 = arith.constant 0 : index
      %30 = vector.load %arg4[%c0_15, %c0_16, %c0_17, %c0_18] : memref<1x3x8x128xf32, #tpu.memory_space<vmem>>, vector<1x3x8x128xf32>
      %31 = vector.shape_cast %30 : vector<1x3x8x128xf32> to vector<3x8x128xf32>
      %32 = vector.shape_cast %29 : vector<3x8x128xf32> to vector<1x3x8x128xf32>
      tpu.vector_store %arg4[%c0_15, %c0_16, %c0_17, %c0_18], %32 {strides = array<i32>} : memref<1x3x8x128xf32, #tpu.memory_space<vmem>>, vector<1x3x8x128xf32>,
    } else {
    }
    return
  }
  func.func @transform_0(%arg0: i32, %arg1: i32) -> (i32, i32) {
    %c1_i32 = arith.constant 1 : i32
    %0 = arith.muli %arg0, %c1_i32 : i32
    %1 = arith.addi %0, %arg1 : i32
    %c0_i32 = arith.constant 0 : i32
    %2 = arith.minsi %1, %c0_i32 : i32
    %c0_i32_0 = arith.constant 0 : i32
    %c0_i32_1 = arith.constant 0 : i32
    return %2, %c0_i32_0 : i32, i32
  }
  func.func @transform_1(%arg0: i32, %arg1: i32) -> (i32, i32) {
    %c1_i32 = arith.constant 1 : i32
    %0 = arith.muli %arg0, %c1_i32 : i32
    %1 = arith.addi %0, %arg1 : i32
    %c0_i32 = arith.constant 0 : i32
    %2 = arith.minsi %1, %c0_i32 : i32
    %c0_i32_0 = arith.constant 0 : i32
    %c0_i32_1 = arith.constant 0 : i32
    return %2, %c0_i32_0 : i32, i32
  }
  func.func @transform_2(%arg0: i32, %arg1: i32) -> (i32, i32, i32, i32) {
    %c0_i32 = arith.constant 0 : i32
    %c0_i32_0 = arith.constant 0 : i32
    %c0_i32_1 = arith.constant 0 : i32
    %c0_i32_2 = arith.constant 0 : i32
    return %arg0, %c0_i32, %c0_i32_0, %c0_i32_1 : i32, i32, i32, i32
  }
}

</mosaic_0001>

<bundles_post_ra>
// kernel: tpu_custom_call.1
= control target key start
LH: loop header
LB: loop body
LE: loop exit
PB: predicated region body
PF: predicated region fallthrough
CT: control target
= control target key end

     0   :  { %7 = vsyncpa [#allocation4], 0  ;;  %s311_s0 = inlined_call_operand.hbm [shape: f32[16,128], index: 0, kind: input, shape index: {}]   ;;  %s312_s1 = inlined_call_operand.hbm [shape: f32[16,128], index: 1, kind: input, shape index: {}]   ;;  %s313_s2 = inlined_call_operand.hbm [shape: f32[1,3,8,128], index: 2, kind: output, shape index: {}]  }
   0x1   :  { %8 = vsyncpa [#allocation7], 0 }
   0x2   :  { %9 = vsyncpa [#allocation5], 0  ;;  %s20_s11 = sshll.u32 %s311_s0, 4  ;;  %s273_s12 = smov [#allocation3]   ;;  %s21_s11 = int_to_ptr.hbm [resolvable:$true] %s20_s11 }
   0x3   :  { %s22_s13 = sshll.u32 %s273_s12, 4  ;;  %s39_s16 = sshll.u32 %s312_s1, 4  ;;  %s23_s13 = int_to_ptr.vmem [resolvable:$true] %s22_s13  ;;  %s40_s16 = int_to_ptr.hbm [resolvable:$true] %s39_s16 }
   0x4   :  { %s274_s17 = smov 128   ;;  %s275_s18 = smov 8  }
   0x5   :  { %28 = dma.hbm_to_vmem [thread:$0]  %s21_s11, 256, %s23_s13, [#allocation4], %s274_s17, %s274_s17, %s275_s18  }
   0x6   :  { %s276_s19 = smov [#allocation6]  }
   0x7   :  { %s41_s20 = sshll.u32 %s276_s19, 4  ;;  %s42_s20 = int_to_ptr.vmem [resolvable:$true] %s41_s20 }
   0x8   :  { %47 = dma.hbm_to_vmem [thread:$0]  %s40_s16, 256, %s42_s20, [#allocation7], %s274_s17, %s274_s17, %s275_s18  }
   0x9   :  { %267 = dma.done.wait [#allocation4], 256  }
   0xa   :  { %268 = vsyncadd [#allocation4], 4294967040 }
   0xb   :  { %269 = dma.done.wait [#allocation7], 256  }
   0xc   :  { %270 = vsyncadd [#allocation7], 4294967040  ;;  %v71_v0 = vld [vmem:[#allocation3] sm:$0xff]  ;;  %v72_v1 = vld [vmem:[#allocation3 + $0x8] sm:$0xff]  ;;  %s277_s0 = smov [#allocation8]   ;;  %s164_s23 = sshll.u32 %s313_s2, 4  ;;  %s165_s23 = int_to_ptr.hbm [resolvable:$true] %s164_s23 }
   0xd   :  { %v73_v2 = vand.u32 2147483647, %v71_v0  ;;  %v74_v3 = vand.u32 2147483647, %v72_v1  ;;  %v91_v4 = vld [vmem:[#allocation6] sm:$0xff]  ;;  %v92_v5 = vld [vmem:[#allocation6 + $0x8] sm:$0xff] }
   0xe   :  { %v113_v8 = vadd.f32 %v92_v5, %v91_v4  ;;  %vm85_vm0 = vcmp.ge.f32.partialorder %v71_v0, 0.0  ;;  %vm86_vm1 = vcmp.ge.f32.partialorder %v72_v1, 0.0  ;;  %s162_s1 = sshll.u32 %s277_s0, 4  ;;  %s163_s1 = int_to_ptr.vmem [resolvable:$true] %s162_s1 }
   0xf   :  { %v75_v6 = vsub.f32 0.0, %v73_v2  ;;  %v76_v7 = vsub.f32 0.0, %v74_v3 }
  0x10   :  { %157 = vst [vmem:[#allocation8 + $0x10] sm:$0xff] %v113_v8 }
  0x11   :  { %v77_v9 = vmul.f32 1.442695, %v75_v6  ;;  %v79_v10 = vmul.f32 1.442695, %v76_v7 }
  0x13   :  { %187 = vpow2.f32 %v77_v9 }
  0x14   :  { %189 = vpow2.f32 %v79_v10 }
  0x19   :  { %v188_v11 = vpop.eup %187 }
  0x1a   :  { %v190_v12 = vpop.eup %189  ;;  %v81_v13 = vadd.f32 1.0, %v188_v11 }
  0x1b   :  { %v82_v14 = vadd.f32 1.0, %v190_v12 }
  0x1c   :  { %191 = vrcp.f32 %v81_v13 }
  0x1d   :  { %193 = vrcp.f32 %v82_v14 }
  0x22   :  { %v192_v15 = vpop.eup %191 }
  0x23   :  { %v194_v16 = vpop.eup %193  ;;  %v87_v17 = vmul.f32 %v192_v15, %v188_v11 }
  0x24   :  { %v88_v18 = vmul.f32 %v194_v16, %v190_v12 }
  0x25   :  { %v89_v19 = vsel %vm85_vm0, %v192_v15, %v87_v17 }
  0x26   :  { %v90_v20 = vsel %vm86_vm1, %v194_v16, %v88_v18  ;;  %v101_v21 = vmul.f32 %v91_v4, %v89_v19 }
  0x27   :  { %v102_v22 = vmul.f32 %v92_v5, %v90_v20  ;;  %v108_v23 = vadd.f32 %v90_v20, %v89_v19 }
  0x29   :  { %v103_v24 = vadd.f32 %v102_v22, %v101_v21  ;;  %156 = vst [vmem:[#allocation8 + $0x8] sm:$0xff] %v108_v23 }
  0x2b   :  { %155 = vst [vmem:[#allocation8] sm:$0xff] %v103_v24 }
  0x2c   :  { %170 = dma.vmem_to_hbm [thread:$0]  %s163_s1, 384, %s165_s23, [#allocation5], %s274_s17, %s274_s17, %s275_s18  }
  0x2d   :  { %271 = dma.done.wait [#allocation5], 384  }
  0x2e   :  { %272 = vsyncadd [#allocation5], 4294966912 }
  0x2f   :  { %175 = vsyncpa [#allocation4], 1 }
  0x30   :  { %176 = vsyncpa [#allocation7], 1 }
  0x31   :  { %177 = vsyncpa [#allocation5], 1 }

</bundles_post_ra>
